<compile_context>
chip_gen: v5e
topology: v5e:2x2
jax: 0.10.0
libtpu: 0.0.40
codegen_flags: <defaults>
</compile_context>

<pallas_src>
import jax
import jax.numpy as jnp
from jax.experimental import pallas as pl
from jax.experimental.pallas import tpu as pltpu


LANE = 128      # feature dims padded to a multiple of the vreg lane width
SUBLANE = 8     # batch/row tiles padded to a multiple of the sublane count


def _round_up(v, m):
    return ((v + m - 1) // m) * m


# --------------------------------------------------------------------------- #
# Kernel 1: tiled linear  (key_mlp / value_mlp / bi2uni_mlp)
# --------------------------------------------------------------------------- #
def linear_kernel(x_ref, w_ref, b_ref, o_ref):
    acc = jnp.dot(x_ref[...], w_ref[...], preferred_element_type=jnp.float32)
    o_ref[...] = (acc + b_ref[...]).astype(o_ref.dtype)


def linear_forward(x, w, b, *, tile_rows=None, max_tile_rows=512,
                   vmem_budget_bytes=32 * 1024 * 1024):
    """out = x @ w + b.  x: [N, Din], w: [Din, Dout], b: [1, Dout].

    Weights are stored [in, out], i.e. already transposed relative to
    nn.Linear's [out, in] so the kernel computes x @ W + b directly.
    """
    n, d_in = x.shape
    d_out = w.shape[1]
    assert w.shape == (d_in, d_out) and b.shape == (1, d_out)
    itemsize = jnp.dtype(x.dtype).itemsize

    # Lane-dense padding (unmasked full-vreg loads/stores, full MXU tiles).
    d_in_p = _round_up(d_in, LANE)
    d_out_p = _round_up(d_out, LANE)
    weight_bytes = 2 * (d_in_p * d_out_p + d_out_p) * itemsize   # x2 pipeline bufs

    if tile_rows is None:
        tile_rows = min(max_tile_rows, _round_up(n, SUBLANE))
        tile_rows = max(SUBLANE, (tile_rows // SUBLANE) * SUBLANE)
        while tile_rows > SUBLANE:
            act_bytes = 2 * tile_rows * (d_in_p + d_out_p) * itemsize
            if weight_bytes + act_bytes <= vmem_budget_bytes:
                break
            tile_rows -= SUBLANE
    tile_rows = max(SUBLANE,
                    _round_up(min(tile_rows, _round_up(n, SUBLANE)), SUBLANE))

    n_p = _round_up(n, tile_rows)
    grid = (n_p // tile_rows,)

    xp = jnp.pad(x, ((0, n_p - n), (0, d_in_p - d_in)))
    wp = jnp.pad(w, ((0, d_in_p - d_in), (0, d_out_p - d_out)))
    bp = jnp.pad(b, ((0, 0), (0, d_out_p - d_out)))

    flops = 2 * n_p * d_in_p * d_out_p + n_p * d_out_p
    bytes_accessed = itemsize * (n_p * d_in_p + d_in_p * d_out_p + d_out_p
                                 + n_p * d_out_p)
    cost = pl.CostEstimate(flops=flops, transcendentals=0,
                           bytes_accessed=bytes_accessed)

    act_bytes = 2 * tile_rows * (d_in_p + d_out_p) * itemsize
    vmem_limit = int(min(48 * 1024 * 1024,
                         max(2 * (weight_bytes + act_bytes), 16 * 1024 * 1024)))

    out_p = pl.pallas_call(
        linear_kernel,
        out_shape=jax.ShapeDtypeStruct((n_p, d_out_p), x.dtype),
        grid_spec=pltpu.PrefetchScalarGridSpec(
            num_scalar_prefetch=0,
            grid=grid,
            in_specs=[
                pl.BlockSpec((tile_rows, d_in_p), lambda i: (i, 0)),  # rows streamed
                pl.BlockSpec((d_in_p, d_out_p), lambda i: (0, 0)),    # W resident
                pl.BlockSpec((1, d_out_p), lambda i: (0, 0)),         # b resident
            ],
            out_specs=pl.BlockSpec((tile_rows, d_out_p), lambda i: (i, 0)),
        ),
        compiler_params=pltpu.CompilerParams(
            dimension_semantics=("parallel",),
            vmem_limit_bytes=vmem_limit),
        cost_estimate=cost,
    )(xp, wp, bp)

    return out_p[:n, :d_out]


# --------------------------------------------------------------------------- #
# Kernel 2: fused attention + output projection (one decoder step)
# --------------------------------------------------------------------------- #
def attn_out_kernel(q_ref, k_ref, v_ref, m_ref, wq_ref, wc_ref, b_ref,
                    score_ref, ctx_ref, ctx_acc):
    # Attention is independent of the vocab tile: compute it once (j == 0),
    # cache the context in VMEM scratch, reuse for every vocab tile of this
    # batch tile.
    @pl.when(pl.program_id(1) == 0)
    def _():
        q = q_ref[...].astype(jnp.float32)          # [TB, Hp]
        k = k_ref[...].astype(jnp.float32)          # [TB, Lp, Hp]
        v = v_ref[...].astype(jnp.float32)          # [TB, Lp, Hp]
        m = m_ref[...].astype(jnp.float32)          # [TB, Lp]
        # energy[b, l] = <query[b], key[b, l]>   (lane reduction -> XLU)
        energy = jnp.sum(q[:, None, :] * k, axis=-1)
        # Row-max shift: exact, since any common shift cancels in the L1
        # renormalisation below.
        energy = energy - jnp.max(energy, axis=-1, keepdims=True)
        # softmax -> mask -> F.normalize(p=1): the softmax denominator cancels
        # against the renormalisation, so only exp / mask / normalise remain.
        p = jnp.exp(energy) * m
        denom = jnp.maximum(jnp.sum(p, axis=-1, keepdims=True), 1e-12)
        attn = p / denom
        ctx = jnp.sum(attn[:, :, None] * v, axis=1)  # [TB, Hp]
        ctx_acc[...] = ctx
        ctx_ref[...] = ctx.astype(ctx_ref.dtype)

    # score = concat(query, context) @ W_out + b, with W_out pre-split into its
    # query / context row-halves -> two MXU matmuls, no in-kernel concat.
    s = jnp.dot(q_ref[...], wq_ref[...], preferred_element_type=jnp.float32)
    s = s + jnp.dot(ctx_acc[...].astype(wc_ref.dtype), wc_ref[...],
                    preferred_element_type=jnp.float32)
    score_ref[...] = (s + b_ref[...]).astype(score_ref.dtype)


def attention_output_step(query, key, value, mask, w_out, b_out, *,
                          tile_b=None, vmem_budget_bytes=32 * 1024 * 1024):
    """One decoder step of the NMT attention + output_mlp.

      query: [B, H]  (decoder hidden state)
      key:   [B, L, H]   value: [B, L, H]   mask: [B, L] (1 = valid)
      w_out: [2H, V] (rows 0..H-1 multiply the query, H..2H-1 the context)
      b_out: [1, V]

    Returns (scores [B, V], context [B, H]).
    """
    B, H = query.shape
    L = key.shape[1]
    V = w_out.shape[1]
    assert key.shape == (B, L, H) and value.shape == (B, L, H)
    assert mask.shape == (B, L)
    assert w_out.shape == (2 * H, V) and b_out.shape == (1, V)
    itemsize = jnp.dtype(query.dtype).itemsize

    # Lane-dense padding of feature / length / vocab dims.  Zero padding is
    # exact: padded key rows get mask 0, padded H columns contribute 0 to both
    # dot products, padded vocab columns / batch rows are sliced off.
    h_p = _round_up(H, LANE)
    l_p = _round_up(L, LANE)
    v_p = _round_up(V, LANE)
    if v_p <= 2048:
        tile_v = v_p
    else:
        tile_v = 1024
        v_p = _round_up(V, tile_v)

    weight_bytes = 2 * (2 * h_p * tile_v + tile_v) * itemsize

    if tile_b is None:
        tile_b = min(128, _round_up(B, SUBLANE))
    tile_b = max(SUBLANE,
                 (min(tile_b, _round_up(B, SUBLANE)) // SUBLANE) * SUBLANE)
    while tile_b > SUBLANE:
        # double-buffered q/k/v/mask/score/ctx tiles + in-kernel 3-D temporaries
        act_bytes = itemsize * tile_b * (
            2 * (2 * l_p * h_p + 2 * h_p + l_p + tile_v) + 3 * l_p * h_p)
        if weight_bytes + act_bytes <= vmem_budget_bytes:
            break
        tile_b -= SUBLANE

    b_p = _round_up(B, tile_b)
    grid = (b_p // tile_b, v_p // tile_v)

    qp = jnp.pad(query, ((0, b_p - B), (0, h_p - H)))
    kp = jnp.pad(key, ((0, b_p - B), (0, l_p - L), (0, h_p - H)))
    vp = jnp.pad(value, ((0, b_p - B), (0, l_p - L), (0, h_p - H)))
    mp = jnp.pad(mask.astype(query.dtype), ((0, b_p - B), (0, l_p - L)))
    wq = jnp.pad(w_out[:H], ((0, h_p - H), (0, v_p - V)))
    wc = jnp.pad(w_out[H:], ((0, h_p - H), (0, v_p - V)))
    bo = jnp.pad(b_out, ((0, 0), (0, v_p - V)))

    flops = b_p * (4 * l_p * h_p + 4 * h_p * v_p)
    bytes_accessed = itemsize * (b_p * (2 * h_p + 2 * l_p * h_p + l_p + v_p)
                                 + 2 * h_p * v_p + v_p)
    cost = pl.CostEstimate(flops=flops, transcendentals=b_p * l_p,
                           bytes_accessed=bytes_accessed)

    act_bytes = itemsize * tile_b * (
        2 * (2 * l_p * h_p + 2 * h_p + l_p + tile_v) + 3 * l_p * h_p)
    vmem_limit = int(min(48 * 1024 * 1024,
                         max(2 * (weight_bytes + act_bytes), 16 * 1024 * 1024)))

    score_p, ctx_p = pl.pallas_call(
        attn_out_kernel,
        out_shape=(jax.ShapeDtypeStruct((b_p, v_p), query.dtype),
                   jax.ShapeDtypeStruct((b_p, h_p), query.dtype)),
        grid_spec=pltpu.PrefetchScalarGridSpec(
            num_scalar_prefetch=0,
            grid=grid,
            in_specs=[
                pl.BlockSpec((tile_b, h_p), lambda i, j: (i, 0)),          # query
                pl.BlockSpec((tile_b, l_p, h_p), lambda i, j: (i, 0, 0)),  # key
                pl.BlockSpec((tile_b, l_p, h_p), lambda i, j: (i, 0, 0)),  # value
                pl.BlockSpec((tile_b, l_p), lambda i, j: (i, 0)),          # mask
                pl.BlockSpec((h_p, tile_v), lambda i, j: (0, j)),          # W_out[:H]
                pl.BlockSpec((h_p, tile_v), lambda i, j: (0, j)),          # W_out[H:]
                pl.BlockSpec((1, tile_v), lambda i, j: (0, j)),            # b_out
            ],
            out_specs=[
                pl.BlockSpec((tile_b, tile_v), lambda i, j: (i, j)),       # scores
                pl.BlockSpec((tile_b, h_p), lambda i, j: (i, 0)),          # context
            ],
            scratch_shapes=[pltpu.VMEM((tile_b, h_p), jnp.float32)],
        ),
        compiler_params=pltpu.CompilerParams(
            dimension_semantics=("parallel", "arbitrary"),
            vmem_limit_bytes=vmem_limit),
        cost_estimate=cost,
    )(qp, kp, vp, mp, wq, wc, bo)

    return score_p[:B, :V], ctx_p[:B, :H]


# --------------------------------------------------------------------------- #
# Parameter init (mimics nn.Linear defaults; weight returned as [in, out])
# --------------------------------------------------------------------------- #
def init_linear_params(key, in_dim, out_dim, dtype=jnp.float32):
    kw, kb = jax.random.split(key)
    bound = 1.0 / (in_dim ** 0.5)
    w = jax.random.uniform(kw, (in_dim, out_dim), dtype, minval=-bound, maxval=bound)
    b = jax.random.uniform(kb, (1, out_dim), dtype, minval=-bound, maxval=bound)
    return w, b


if __name__ == "__main__":
    # Small shapes consistent with the NMT module: batch=4 sentences,
    # source length 10, hidden_size 64 (encoder is bidirectional -> 2H=128
    # features), target vocab 512.
    B, L, H, V = 4, 10, 64, 512

    root = jax.random.PRNGKey(0)
    ks = jax.random.split(root, 6)

    # Stand-in for the bidirectional encoder LSTM output [L, B, 2H] and the
    # concatenated final cell state [B, 2H].
    enc_out = jax.random.normal(ks[0], (L, B, 2 * H), jnp.float32) * 0.5
    c_cat = jax.random.normal(ks[1], (B, 2 * H), jnp.float32) * 0.5

    wk, bk = init_linear_params(ks[2], 2 * H, H)     # key_mlp
    wv, bv = init_linear_params(ks[3], 2 * H, H)     # value_mlp
    wb, bb = init_linear_params(ks[4], 2 * H, H)     # bi2uni_mlp
    wo, bo = init_linear_params(ks[5], 2 * H, V)     # output_mlp

    # --- encoder-side projections (Pallas linear kernel) ---------------------
    enc_flat = enc_out.reshape(L * B, 2 * H)
    key_proj = linear_forward(enc_flat, wk, bk).reshape(L, B, H)
    value_proj = linear_forward(enc_flat, wv, bv).reshape(L, B, H)
    c_n = linear_forward(c_cat, wb, bb)              # bi2uni_mlp(cat(c_n))
    h_n = jnp.tanh(c_n)                              # decoder init hidden state

    # Attention mask built from source lengths (longest sentence = L).
    lengths = jnp.array([10, 7, 4, 9], jnp.int32)
    mask = (jnp.arange(L)[None, :] < lengths[:, None]).astype(jnp.float32)

    # TODO(synk): embedding lookups, the packed-sequence bidirectional encoder
    # LSTM, the decoder LSTM cell recurrence, teacher-forcing random branching
    # and CrossEntropyLoss(ignore_index=0) have no clean Pallas equivalent;
    # the decoder hidden state (query) is stood in by h_n here.
    query = h_n                                          # [B, H]
    key_b = jnp.transpose(key_proj, (1, 0, 2))           # [B, L, H]
    value_b = jnp.transpose(value_proj, (1, 0, 2))       # [B, L, H]

    score, context = attention_output_step(query, key_b, value_b, mask, wo, bo)
    score = jax.block_until_ready(score)
    context = jax.block_until_ready(context)

    # --- pure-JAX reference (unpadded math, identical semantics) -------------
    ref_key = (enc_flat @ wk + bk).reshape(L, B, H)
    ref_val = (enc_flat @ wv + bv).reshape(L, B, H)
    ref_cn = c_cat @ wb + bb
    assert jnp.allclose(key_proj, ref_key, atol=1e-4, rtol=1e-4)
    assert jnp.allclose(value_proj, ref_val, atol=1e-4, rtol=1e-4)
    assert jnp.allclose(c_n, ref_cn, atol=1e-4, rtol=1e-4)

    energy = jnp.einsum('bh,blh->bl', query, key_b)
    attn = jax.nn.softmax(energy, axis=-1) * mask
    attn = attn / jnp.maximum(attn.sum(-1, keepdims=True), 1e-12)
    ref_ctx = jnp.einsum('bl,blh->bh', attn, value_b)
    ref_score = jnp.concatenate([query, ref_ctx], axis=-1) @ wo + bo

    assert score.shape == (B, V) and context.shape == (B, H)
    assert jnp.allclose(context, ref_ctx, atol=1e-4, rtol=1e-4)
    assert jnp.allclose(score, ref_score, atol=1e-4, rtol=1e-4)

    print("KERNEL_OK")
</pallas_src>

<mosaic_0001>
module attributes {stable_mosaic.version = 11 : i64} {
  func.func @linear_kernel(%arg0: i32, %arg1: memref<40x128xf32, #tpu.memory_space<vmem>>, %arg2: memref<128x128xf32, #tpu.memory_space<vmem>>, %arg3: memref<1x128xf32, #tpu.memory_space<vmem>>, %arg4: memref<40x128xf32, #tpu.memory_space<vmem>>) attributes {dimension_semantics = [#tpu.dimension_semantics<parallel>], iteration_bounds = array<i64: 1>, scalar_prefetch = 0 : i64, scratch_operands = 0 : i64, tpu.core_type = #tpu.core_type<tc>, window_params = [{transform_indices = @transform_0, window_bounds = array<i64: 40, 128>}, {pipeline_mode = #tpu.pipeline_mode<synchronous>, transform_indices = @transform_1, window_bounds = array<i64: 128, 128>}, {pipeline_mode = #tpu.pipeline_mode<synchronous>, transform_indices = @transform_2, window_bounds = array<i64: 1, 128>}, {transform_indices = @transform_3, window_bounds = array<i64: 40, 128>}]} {
    %c0 = arith.constant 0 : index
    %c0_0 = arith.constant 0 : index
    %0 = vector.load %arg1[%c0, %c0_0] : memref<40x128xf32, #tpu.memory_space<vmem>>, vector<40x128xf32>
    %c0_1 = arith.constant 0 : index
    %c0_2 = arith.constant 0 : index
    %1 = vector.load %arg2[%c0_1, %c0_2] : memref<128x128xf32, #tpu.memory_space<vmem>>, vector<128x128xf32>
    %cst = arith.constant dense<0.000000e+00> : vector<40x128xf32>
    %2 = tpu.matmul %0, %1, %cst {dimension_numbers = #tpu.dot_dimension_numbers<[1], [0], [0], [1], [0, 0, 1, 1], [], []>} : vector<40x128xf32>, vector<128x128xf32>, vector<40x128xf32> -> vector<40x128xf32>
    %c0_3 = arith.constant 0 : index
    %c0_4 = arith.constant 0 : index
    %3 = vector.load %arg3[%c0_3, %c0_4] : memref<1x128xf32, #tpu.memory_space<vmem>>, vector<1x128xf32>
    %4 = vector.broadcast %3 : vector<1x128xf32> to vector<40x128xf32>
    %5 = arith.addf %2, %4 : vector<40x128xf32>
    %c0_5 = arith.constant 0 : index
    %c0_6 = arith.constant 0 : index
    %6 = vector.load %arg4[%c0_5, %c0_6] : memref<40x128xf32, #tpu.memory_space<vmem>>, vector<40x128xf32>
    tpu.vector_store %arg4[%c0_5, %c0_6], %5 {strides = array<i32>} : memref<40x128xf32, #tpu.memory_space<vmem>>, vector<40x128xf32>,
    return
  }
  func.func @transform_0(%arg0: i32) -> (i32, i32) {
    %c0_i32 = arith.constant 0 : i32
    %c0_i32_0 = arith.constant 0 : i32
    return %arg0, %c0_i32 : i32, i32
  }
  func.func @transform_1(%arg0: i32) -> (i32, i32) {
    %c0_i32 = arith.constant 0 : i32
    %c0_i32_0 = arith.constant 0 : i32
    %c0_i32_1 = arith.constant 0 : i32
    return %c0_i32, %c0_i32_0 : i32, i32
  }
  func.func @transform_2(%arg0: i32) -> (i32, i32) {
    %c0_i32 = arith.constant 0 : i32
    %c0_i32_0 = arith.constant 0 : i32
    %c0_i32_1 = arith.constant 0 : i32
    return %c0_i32, %c0_i32_0 : i32, i32
  }
  func.func @transform_3(%arg0: i32) -> (i32, i32) {
    %c0_i32 = arith.constant 0 : i32
    %c0_i32_0 = arith.constant 0 : i32
    return %arg0, %c0_i32 : i32, i32
  }
}

</mosaic_0001>

<bundles_post_ra>
// kernel: tpu_custom_call.1
= control target key start
LH: loop header
LB: loop body
LE: loop exit
PB: predicated region body
PF: predicated region fallthrough
CT: control target
= control target key end

     0   :  { %8 = vsyncpa [#allocation3], 0  ;;  %s307_s0 = inlined_call_operand.hbm [shape: f32[40,128], index: 0, kind: input, shape index: {}]   ;;  %s308_s1 = inlined_call_operand.hbm [shape: f32[128,128], index: 1, kind: input, shape index: {}]   ;;  %s309_s2 = inlined_call_operand.vmem [shape: f32[1,128], index: 2, kind: input, shape index: {}]   ;;  %s310_s3 = inlined_call_operand.hbm [shape: f32[40,128], index: 3, kind: output, shape index: {}]  }
   0x1   :  { %9 = vsyncpa [#allocation6], 0 }
   0x2   :  { %10 = vsyncpa [#allocation4], 0  ;;  %s15_s14 = sshll.u32 %s307_s0, 4  ;;  %s261_s15 = smov [#allocation2]   ;;  %s16_s14 = int_to_ptr.hbm [resolvable:$true] %s15_s14 }
   0x3   :  { %s17_s16 = sshll.u32 %s261_s15, 4  ;;  %s28_s19 = sshll.u32 %s308_s1, 4  ;;  %s18_s16 = int_to_ptr.vmem [resolvable:$true] %s17_s16  ;;  %s29_s19 = int_to_ptr.hbm [resolvable:$true] %s28_s19 }
   0x4   :  { %s262_s20 = smov 128   ;;  %s263_s21 = smov 8  }
   0x5   :  { %23 = dma.hbm_to_vmem [thread:$0]  %s16_s14, 640, %s18_s16, [#allocation3], %s262_s20, %s262_s20, %s263_s21  }
   0x6   :  { %s264_s22 = smov [#allocation5]  }
   0x7   :  { %s30_s23 = sshll.u32 %s264_s22, 4  ;;  %s31_s23 = int_to_ptr.vmem [resolvable:$true] %s30_s23 }
   0x8   :  { %36 = dma.hbm_to_vmem [thread:$0]  %s29_s19, 2048, %s31_s23, [#allocation6], %s262_s20, %s262_s20, %s263_s21  }
   0x9   :  { %255 = dma.done.wait [#allocation3], 640  }
   0xa   :  { %256 = vsyncadd [#allocation3], 4294966656 }
   0xb   :  { %257 = dma.done.wait [#allocation6], 2048  }
   0xc   :  { %258 = vsyncadd [#allocation6], 4294965248  ;;  %v67_v0 = vld [vmem:[#allocation5 + $0x78] sm:$0xff]  ;;  %v66_v1 = vld [vmem:[#allocation5 + $0x70] sm:$0xff]  ;;  %s265_s24 = smov [#allocation7]   ;;  %s115_s28 = sshll.u32 %s310_s3, 4  ;;  %s116_s28 = int_to_ptr.hbm [resolvable:$true] %s115_s28 }
   0xd   :  { %131 = vmatpush.msra.mxu3 %v67_v0  ;;  %130 = vmatpush.msra.mxu2 %v67_v0  ;;  %v65_v2 = vld [vmem:[#allocation5 + $0x68] sm:$0xff]  ;;  %v64_v3 = vld [vmem:[#allocation5 + $0x60] sm:$0xff]  ;;  %v63_v4 = vld [vmem:[#allocation5 + $0x58] sm:$0xff]  ;;  %s113_s25 = sshll.u32 %s265_s24, 4  ;;  %s114_s25 = int_to_ptr.vmem [resolvable:$true] %s113_s25 }
   0xe   :  { %72 = vmatpush.msra.mxu0 %v67_v0  ;;  %129 = vmatpush.msra.mxu1 %v67_v0  ;;  %v62_v5 = vld [vmem:[#allocation5 + $0x50] sm:$0xff]  ;;  %v61_v6 = vld [vmem:[#allocation5 + $0x48] sm:$0xff]  ;;  %v60_v7 = vld [vmem:[#allocation5 + $0x40] sm:$0xff] }
   0xf   :  { %134 = vmatpush.msra.mxu3 %v66_v1  ;;  %133 = vmatpush.msra.mxu2 %v66_v1  ;;  %v59_v8 = vld [vmem:[#allocation5 + $0x38] sm:$0xff]  ;;  %v58_v9 = vld [vmem:[#allocation5 + $0x30] sm:$0xff]  ;;  %v57_v10 = vld [vmem:[#allocation5 + $0x28] sm:$0xff] }
  0x10   :  { %73 = vmatpush.msra.mxu0 %v66_v1  ;;  %132 = vmatpush.msra.mxu1 %v66_v1  ;;  %v56_v11 = vld [vmem:[#allocation5 + $0x20] sm:$0xff]  ;;  %v55_v12 = vld [vmem:[#allocation5 + $0x18] sm:$0xff]  ;;  %v54_v13 = vld [vmem:[#allocation5 + $0x10] sm:$0xff] }
  0x11   :  { %137 = vmatpush.msra.mxu3 %v65_v2  ;;  %136 = vmatpush.msra.mxu2 %v65_v2  ;;  %v53_v14 = vld [vmem:[#allocation5 + $0x8] sm:$0xff]  ;;  %v52_v15 = vld [vmem:[#allocation5] sm:$0xff]  ;;  %v50_v16 = vld [vmem:[#allocation2 + $0x18] sm:$0xff] }
  0x12   :  { %74 = vmatpush.msra.mxu0 %v65_v2  ;;  %135 = vmatpush.msra.mxu1 %v65_v2  ;;  %v49_v17 = vld [vmem:[#allocation2 + $0x10] sm:$0xff]  ;;  %v47_v18 = vld [vmem:[#allocation2] sm:$0xff]  ;;  %v48_v19 = vld [vmem:[#allocation2 + $0x8] sm:$0xff] }
  0x13   :  { %140 = vmatpush.msra.mxu3 %v64_v3  ;;  %139 = vmatpush.msra.mxu2 %v64_v3  ;;  %v51_v20 = vld [vmem:[#allocation2 + $0x20] sm:$0xff] }
  0x14   :  { %75 = vmatpush.msra.mxu0 %v64_v3  ;;  %138 = vmatpush.msra.mxu1 %v64_v3  ;;  %v182_v21 = vld [vmem:[%s309_s2] ss:$0 sm:$0xff] }
  0x15   :  { %143 = vmatpush.msra.mxu3 %v63_v4  ;;  %142 = vmatpush.msra.mxu2 %v63_v4 }
  0x16   :  { %76 = vmatpush.msra.mxu0 %v63_v4  ;;  %141 = vmatpush.msra.mxu1 %v63_v4 }
  0x17   :  { %146 = vmatpush.msra.mxu3 %v62_v5  ;;  %145 = vmatpush.msra.mxu2 %v62_v5 }
  0x18   :  { %77 = vmatpush.msra.mxu0 %v62_v5  ;;  %144 = vmatpush.msra.mxu1 %v62_v5 }
  0x19   :  { %149 = vmatpush.msra.mxu3 %v61_v6  ;;  %148 = vmatpush.msra.mxu2 %v61_v6 }
  0x1a   :  { %78 = vmatpush.msra.mxu0 %v61_v6  ;;  %147 = vmatpush.msra.mxu1 %v61_v6 }
  0x1b   :  { %152 = vmatpush.msra.mxu3 %v60_v7  ;;  %151 = vmatpush.msra.mxu2 %v60_v7 }
  0x1c   :  { %79 = vmatpush.msra.mxu0 %v60_v7  ;;  %150 = vmatpush.msra.mxu1 %v60_v7 }
  0x1d   :  { %155 = vmatpush.msra.mxu3 %v59_v8  ;;  %154 = vmatpush.msra.mxu2 %v59_v8 }
  0x1e   :  { %80 = vmatpush.msra.mxu0 %v59_v8  ;;  %153 = vmatpush.msra.mxu1 %v59_v8 }
  0x1f   :  { %158 = vmatpush.msra.mxu3 %v58_v9  ;;  %157 = vmatpush.msra.mxu2 %v58_v9 }
  0x20   :  { %81 = vmatpush.msra.mxu0 %v58_v9  ;;  %156 = vmatpush.msra.mxu1 %v58_v9 }
  0x21   :  { %161 = vmatpush.msra.mxu3 %v57_v10  ;;  %160 = vmatpush.msra.mxu2 %v57_v10 }
  0x22   :  { %82 = vmatpush.msra.mxu0 %v57_v10  ;;  %159 = vmatpush.msra.mxu1 %v57_v10 }
  0x23   :  { %164 = vmatpush.msra.mxu3 %v56_v11  ;;  %163 = vmatpush.msra.mxu2 %v56_v11 }
  0x24   :  { %83 = vmatpush.msra.mxu0 %v56_v11  ;;  %162 = vmatpush.msra.mxu1 %v56_v11 }
  0x25   :  { %167 = vmatpush.msra.mxu3 %v55_v12  ;;  %166 = vmatpush.msra.mxu2 %v55_v12 }
  0x26   :  { %84 = vmatpush.msra.mxu0 %v55_v12  ;;  %165 = vmatpush.msra.mxu1 %v55_v12 }
  0x27   :  { %170 = vmatpush.msra.mxu3 %v54_v13  ;;  %169 = vmatpush.msra.mxu2 %v54_v13 }
  0x28   :  { %85 = vmatpush.msra.mxu0 %v54_v13  ;;  %168 = vmatpush.msra.mxu1 %v54_v13 }
  0x29   :  { %173 = vmatpush.msra.mxu3 %v53_v14  ;;  %172 = vmatpush.msra.mxu2 %v53_v14 }
  0x2a   :  { %86 = vmatpush.msra.mxu0 %v53_v14  ;;  %171 = vmatpush.msra.mxu1 %v53_v14 }
  0x2b   :  { %176 = vmatpush.msra.mxu3 %v52_v15  ;;  %175 = vmatpush.msra.mxu2 %v52_v15 }
  0x2c   :  { %97 = vmatmul.f32.vlgmr.msra.gmra.mxu3 %v50_v16  ;;  %94 = vmatmul.f32.vlgmr.msra.gmra.mxu2 %v49_v17 }
  0x2d   :  { %87 = vmatpush.msra.mxu0 %v52_v15  ;;  %174 = vmatpush.msra.mxu1 %v52_v15 }
  0x2e   :  { %88 = vmatmul.f32.vlgmr.msra.gmra.mxu0 %v47_v18  ;;  %91 = vmatmul.f32.vlgmr.msra.gmra.mxu1 %v48_v19 }
  0x34   :  { %100 = vmatmul.f32.gmra.mxu3 %v51_v20 }
  0xab   :  { %v89_v22 = vpop.f32.mrf.mxu0  ;;  %v92_v23 = vpop.f32.mrf.mxu1 }
  0xac   :  { %v90_v24 = vadd.f32 %v182_v21, %v89_v22  ;;  %v93_v25 = vadd.f32 %v182_v21, %v92_v23 }
  0xae   :  { %104 = vst [vmem:[#allocation7] sm:$0xff] %v90_v24 }
  0xaf   :  { %v98_v26 = vpop.f32.mrf.mxu3  ;;  %105 = vst [vmem:[#allocation7 + $0x8] sm:$0xff] %v93_v25  ;;  %v95_v27 = vpop.f32.mrf.mxu2 }
  0xb0   :  { %v99_v28 = vadd.f32 %v182_v21, %v98_v26  ;;  %v96_v29 = vadd.f32 %v182_v21, %v95_v27 }
  0xb2   :  { %107 = vst [vmem:[#allocation7 + $0x18] sm:$0xff] %v99_v28 }
  0xb3   :  { %106 = vst [vmem:[#allocation7 + $0x10] sm:$0xff] %v96_v29 }
  0xb7   :  { %v101_v30 = vpop.f32.mrf.mxu3 }
  0xb8   :  { %v102_v31 = vadd.f32 %v182_v21, %v101_v30 }
  0xba   :  { %108 = vst [vmem:[#allocation7 + $0x20] sm:$0xff] %v102_v31 }
  0xbb   :  { %121 = dma.vmem_to_hbm [thread:$0]  %s114_s25, 640, %s116_s28, [#allocation4], %s262_s20, %s262_s20, %s263_s21  }
  0xbc   :  { %259 = dma.done.wait [#allocation4], 640  }
  0xbd   :  { %260 = vsyncadd [#allocation4], 4294966656 }
  0xbe   :  { %126 = vsyncpa [#allocation3], 1 }
  0xbf   :  { %127 = vsyncpa [#allocation6], 1 }
  0xc0   :  { %128 = vsyncpa [#allocation4], 1 }

</bundles_post_ra>
